<compile_context>
chip_gen: v7x
topology: tpu7x:2x2x1
jax: 0.10.0
libtpu: 0.0.40
codegen_flags: <defaults>
</compile_context>

<pallas_src>
import jax
import jax.numpy as jnp
from jax.experimental import pallas as pl
from jax.experimental.pallas import tpu as pltpu


def _round_up(x, m):
    return (x + m - 1) // m * m


# ----------------------------------------------------------------------------
# Kernel
# ----------------------------------------------------------------------------
def peer_loss_kernel(alpha_ref, x_ref, t_ref, xp_ref, tp_ref, out_ref):
    # x_ref / xp_ref: (TILE_N, C) logits in their native dtype.
    # t_ref / tp_ref: (TILE_N, 1) int32 labels.
    # out_ref:        (TILE_N, 1) f32 per-sample loss.
    c = x_ref.shape[-1]
    t = t_ref[...]
    tp = tp_ref[...]

    # (1, C) iota; broadcasts against (TILE_N, 1) targets in the compare — no
    # full-tile int32 temp.
    class_ids = jax.lax.broadcasted_iota(jnp.int32, (1, c), 1)

    # ---- per-sample cross entropy on `inputs`: logsumexp(x) - x[target]
    x_nat = x_ref[...]
    # One-hot select+sum on the native dtype (exact: a single nonzero/row);
    # only the (TILE_N, 1) result is upcast.
    x_t = jnp.sum(jnp.where(class_ids == t, x_nat, 0),
                  axis=-1, keepdims=True).astype(jnp.float32)
    x = x_nat.astype(jnp.float32)
    m = jnp.max(x, axis=-1, keepdims=True)
    lse = m + jnp.log(jnp.sum(jnp.exp(x - m), axis=-1, keepdims=True))
    ce = lse - x_t                                               # (TILE_N, 1)

    # ---- peer term in log space (no full-softmax materialization):
    #      softmax(xp)[tp] == exp(xp[tp] - logsumexp(xp))
    #      peer = -log(softmax(xp)[tp] + 1e-8)   <- preserve the +1e-8
    xp_nat = xp_ref[...]
    xp_tp = jnp.sum(jnp.where(class_ids == tp, xp_nat, 0),
                    axis=-1, keepdims=True).astype(jnp.float32)
    xp = xp_nat.astype(jnp.float32)
    mp = jnp.max(xp, axis=-1, keepdims=True)
    lse_p = mp + jnp.log(jnp.sum(jnp.exp(xp - mp), axis=-1, keepdims=True))
    peer = -jnp.log(jnp.exp(xp_tp - lse_p) + 1e-8)               # (TILE_N, 1)

    alpha = alpha_ref[0]
    out_ref[...] = ce - alpha * peer


# ----------------------------------------------------------------------------
# Generation-aware tile planning
# ----------------------------------------------------------------------------
def _vmem_capacity_bytes():
    try:
        info = pltpu.get_tpu_info()
        v = getattr(info, "vmem_capacity_bytes", None)
        if v:
            return int(v)
    except Exception:
        pass
    # Unknown chip: assume the most constrained layout (v7x-like, 64 MiB/TC).
    return 64 * 1024 * 1024


def _plan_tiling(n, c, itemsize):
    """Return (tile_n, vmem_limit_bytes, deep_pipeline)."""
    vmem_cap = _vmem_capacity_bytes()
    if vmem_cap <= 64 * 1024 * 1024:
        # v7x-like: 64 MiB VMEM per TC, 2 TCs.  Stay conservative on VMEM and
        # keep >= 8 grid steps so the ("parallel",) batch axis load-balances.
        buf_bytes = int(2.5 * 1024 * 1024)
        vmem_limit = 48 * 1024 * 1024
        min_steps = 8
    else:
        # v5e / v6e: 128 MiB VMEM, single TC -> bigger per-step DMAs.
        buf_bytes = 4 * 1024 * 1024
        vmem_limit = 64 * 1024 * 1024
        min_steps = 1

    # Sublane packing granularity: 8 rows/vreg for 32-bit, 16 for bf16, 32 for 8-bit.
    sub = max(8, 32 // max(int(itemsize), 1))
    row_bytes = max(c * int(itemsize), 1)        # native dtype, not f32-equivalent

    tile = buf_bytes // row_bytes
    tile = min(tile, 8192)                       # bound Mosaic per-op unrolling
    if min_steps > 1:
        tile = min(tile, _round_up(pl.cdiv(n, min_steps), sub))
    tile = max(sub, (tile // sub) * sub)
    if tile >= n:
        tile = _round_up(max(n, 1), sub)

    steps = pl.cdiv(n, tile)
    # Wide-C regime (huge vocab forces tiny row tiles): deepen the pipeline.
    deep_pipeline = (tile <= 64) and (steps >= 4)
    return tile, vmem_limit, deep_pipeline


# ----------------------------------------------------------------------------
# Wrapper
# ----------------------------------------------------------------------------
def peer_loss(epoch, inputs, targets, inputs_peer, targets_peer, alpha_plan=None):
    """Per-sample peer loss. inputs/inputs_peer: (N, C); targets/targets_peer: (N,)."""
    n, c = inputs.shape

    # alpha as a runtime scalar (no recompile per epoch).
    if alpha_plan is None:
        alpha_arr = jnp.ones((1,), dtype=jnp.float32)
    else:
        alpha_arr = jnp.asarray(alpha_plan, dtype=jnp.float32)[jnp.asarray(epoch)].reshape(1)

    # Labels as (N, 1) int32; logits stay in their native dtype (bf16 stays bf16).
    t = targets.astype(jnp.int32).reshape(n, 1)
    tp = targets_peer.astype(jnp.int32).reshape(n, 1)

    itemsize = jnp.dtype(inputs.dtype).itemsize
    tile_n, vmem_limit, deep_pipeline = _plan_tiling(n, c, itemsize)
    grid = (pl.cdiv(n, tile_n),)   # ragged last block: no input padding needed

    def _logits_spec():
        if deep_pipeline:
            return pl.BlockSpec((tile_n, c), lambda i: (i, 0),
                                pipeline_mode=pl.Buffered(3))
        return pl.BlockSpec((tile_n, c), lambda i: (i, 0))

    def _label_spec():
        return pl.BlockSpec((tile_n, 1), lambda i: (i, 0))

    out = pl.pallas_call(
        peer_loss_kernel,
        out_shape=jax.ShapeDtypeStruct((n, 1), jnp.float32),
        grid=grid,
        in_specs=[
            pl.BlockSpec(memory_space=pltpu.SMEM),   # alpha (1,)
            _logits_spec(),                          # inputs       (N, C)
            _label_spec(),                           # targets      (N, 1)
            _logits_spec(),                          # inputs_peer  (N, C)
            _label_spec(),                           # targets_peer (N, 1)
        ],
        out_specs=pl.BlockSpec((tile_n, 1), lambda i: (i, 0)),
        compiler_params=pltpu.CompilerParams(
            dimension_semantics=("parallel",),       # shards batch tiles across v7x's 2 TCs
            vmem_limit_bytes=vmem_limit,
        ),
    )(alpha_arr, inputs, t, inputs_peer, tp)
    return out[:, 0]


# ----------------------------------------------------------------------------
# Pure-JAX reference
# ----------------------------------------------------------------------------
def peer_loss_ref(epoch, inputs, targets, inputs_peer, targets_peer, alpha_plan=None):
    alpha = 1.0 if alpha_plan is None else float(alpha_plan[epoch])
    logp = jax.nn.log_softmax(inputs.astype(jnp.float32), axis=1)
    ce = -jnp.take_along_axis(logp, targets[:, None], axis=1)[:, 0]
    sm = jax.nn.softmax(inputs_peer.astype(jnp.float32), axis=1)
    peer = -jnp.log(jnp.take_along_axis(sm, targets_peer[:, None], axis=1)[:, 0] + 1e-8)
    return ce - alpha * peer


if __name__ == "__main__":
    key = jax.random.PRNGKey(0)

    # --- case 1: small batch, no alpha plan ---------------------------------
    N, C = 8, 32
    k1, k2, k3, k4 = jax.random.split(key, 4)
    inputs = jax.random.normal(k1, (N, C), dtype=jnp.float32)
    targets = jax.random.randint(k2, (N,), 0, C, dtype=jnp.int32)
    # Deterministic stand-in for the module's np.random shuffle of the peer pair.
    inputs_peer = inputs[jax.random.permutation(k3, N)]
    targets_peer = targets[jax.random.permutation(k4, N)]

    out = peer_loss(0, inputs, targets, inputs_peer, targets_peer, alpha_plan=None)
    out = jax.block_until_ready(out)
    ref = peer_loss_ref(0, inputs, targets, inputs_peer, targets_peer, alpha_plan=None)
    assert out.shape == (N,)
    assert jnp.allclose(out, ref, atol=1e-4, rtol=1e-4), (out, ref)

    # --- case 2: non-aligned batch (exercises the ragged last block) + plan -
    N2, C2 = 300, 40
    k5, k6, k7, k8 = jax.random.split(jax.random.PRNGKey(1), 4)
    inputs2 = jax.random.normal(k5, (N2, C2), dtype=jnp.float32)
    targets2 = jax.random.randint(k6, (N2,), 0, C2, dtype=jnp.int32)
    inputs2_peer = inputs2[jax.random.permutation(k7, N2)]
    targets2_peer = targets2[jax.random.permutation(k8, N2)]
    alpha_plan = [0.5, 0.8]

    out2 = peer_loss(1, inputs2, targets2, inputs2_peer, targets2_peer, alpha_plan=alpha_plan)
    out2 = jax.block_until_ready(out2)
    ref2 = peer_loss_ref(1, inputs2, targets2, inputs2_peer, targets2_peer, alpha_plan=alpha_plan)
    assert out2.shape == (N2,)
    assert jnp.allclose(out2, ref2, atol=1e-4, rtol=1e-4), (out2, ref2)

    # --- case 3: bf16 logits (native-dtype streaming + select-sum path) -----
    N3, C3 = 40, 64
    k9, k10, k11, k12 = jax.random.split(jax.random.PRNGKey(2), 4)
    inputs3 = jax.random.normal(k9, (N3, C3), dtype=jnp.float32).astype(jnp.bfloat16)
    targets3 = jax.random.randint(k10, (N3,), 0, C3, dtype=jnp.int32)
    inputs3_peer = inputs3[jax.random.permutation(k11, N3)]
    targets3_peer = targets3[jax.random.permutation(k12, N3)]

    out3 = peer_loss(0, inputs3, targets3, inputs3_peer, targets3_peer, alpha_plan=None)
    out3 = jax.block_until_ready(out3)
    ref3 = peer_loss_ref(0, inputs3, targets3, inputs3_peer, targets3_peer, alpha_plan=None)
    assert out3.shape == (N3,)
    assert jnp.allclose(out3, ref3, atol=2e-3, rtol=2e-3), (out3, ref3)

    print("KERNEL_OK")
</pallas_src>

<mosaic_0001>
module attributes {stable_mosaic.version = 11 : i64} {
  func.func @peer_loss_kernel(%arg0: i32, %arg1: memref<1xf32, #tpu.memory_space<smem>>, %arg2: memref<8x32xf32, #tpu.memory_space<vmem>>, %arg3: memref<8x1xi32, #tpu.memory_space<vmem>>, %arg4: memref<8x32xf32, #tpu.memory_space<vmem>>, %arg5: memref<8x1xi32, #tpu.memory_space<vmem>>, %arg6: memref<8x1xf32, #tpu.memory_space<vmem>>) attributes {dimension_semantics = [#tpu.dimension_semantics<parallel>], iteration_bounds = array<i64: 1>, scalar_prefetch = 0 : i64, scratch_operands = 0 : i64, tpu.core_type = #tpu.core_type<tc>, window_params = [{transform_indices = @transform_0, window_bounds = array<i64: 1>}, {transform_indices = @transform_1, window_bounds = array<i64: 8, 32>}, {transform_indices = @transform_2, window_bounds = array<i64: 8, 1>}, {transform_indices = @transform_3, window_bounds = array<i64: 8, 32>}, {transform_indices = @transform_4, window_bounds = array<i64: 8, 1>}, {transform_indices = @transform_5, window_bounds = array<i64: 8, 1>}]} {
    %c0 = arith.constant 0 : index
    %c0_0 = arith.constant 0 : index
    %0 = vector.load %arg3[%c0, %c0_0] : memref<8x1xi32, #tpu.memory_space<vmem>>, vector<8x1xi32>
    %c0_1 = arith.constant 0 : index
    %c0_2 = arith.constant 0 : index
    %1 = vector.load %arg5[%c0_1, %c0_2] : memref<8x1xi32, #tpu.memory_space<vmem>>, vector<8x1xi32>
    %2 = tpu.iota {dimensions = array<i32: 1>} : vector<1x32xi32>
    %c0_3 = arith.constant 0 : index
    %c0_4 = arith.constant 0 : index
    %3 = vector.load %arg2[%c0_3, %c0_4] : memref<8x32xf32, #tpu.memory_space<vmem>>, vector<8x32xf32>
    %4 = vector.broadcast %2 : vector<1x32xi32> to vector<8x32xi32>
    %5 = vector.broadcast %0 : vector<8x1xi32> to vector<8x32xi32>
    %6 = arith.cmpi eq, %4, %5 : vector<8x32xi32>
    %c0_i32 = arith.constant 0 : i32
    %7 = arith.sitofp %c0_i32 : i32 to f32
    %8 = vector.broadcast %7 : f32 to vector<8x32xf32>
    %9 = arith.select %6, %3, %8 : vector<8x32xi1>, vector<8x32xf32>
    %cst = arith.constant dense<0.000000e+00> : vector<8xf32>
    %10 = vector.multi_reduction <add>, %9, %cst [1] : vector<8x32xf32> to vector<8xf32>
    %11 = vector.shape_cast %10 : vector<8xf32> to vector<8x1xf32>
    %cst_5 = arith.constant dense<0xFF800000> : vector<8xf32>
    %12 = vector.multi_reduction <maximumf>, %3, %cst_5 [1] : vector<8x32xf32> to vector<8xf32>
    %13 = vector.shape_cast %12 : vector<8xf32> to vector<8x1xf32>
    %14 = vector.broadcast %13 : vector<8x1xf32> to vector<8x32xf32>
    %15 = arith.subf %3, %14 : vector<8x32xf32>
    %16 = math.exp %15 : vector<8x32xf32>
    %cst_6 = arith.constant dense<0.000000e+00> : vector<8xf32>
    %17 = vector.multi_reduction <add>, %16, %cst_6 [1] : vector<8x32xf32> to vector<8xf32>
    %18 = vector.shape_cast %17 : vector<8xf32> to vector<8x1xf32>
    %19 = math.log %18 : vector<8x1xf32>
    %20 = arith.addf %13, %19 : vector<8x1xf32>
    %21 = arith.subf %20, %11 : vector<8x1xf32>
    %c0_7 = arith.constant 0 : index
    %c0_8 = arith.constant 0 : index
    %22 = vector.load %arg4[%c0_7, %c0_8] : memref<8x32xf32, #tpu.memory_space<vmem>>, vector<8x32xf32>
    %23 = vector.broadcast %2 : vector<1x32xi32> to vector<8x32xi32>
    %24 = vector.broadcast %1 : vector<8x1xi32> to vector<8x32xi32>
    %25 = arith.cmpi eq, %23, %24 : vector<8x32xi32>
    %c0_i32_9 = arith.constant 0 : i32
    %26 = arith.sitofp %c0_i32_9 : i32 to f32
    %27 = vector.broadcast %26 : f32 to vector<8x32xf32>
    %28 = arith.select %25, %22, %27 : vector<8x32xi1>, vector<8x32xf32>
    %cst_10 = arith.constant dense<0.000000e+00> : vector<8xf32>
    %29 = vector.multi_reduction <add>, %28, %cst_10 [1] : vector<8x32xf32> to vector<8xf32>
    %30 = vector.shape_cast %29 : vector<8xf32> to vector<8x1xf32>
    %cst_11 = arith.constant dense<0xFF800000> : vector<8xf32>
    %31 = vector.multi_reduction <maximumf>, %22, %cst_11 [1] : vector<8x32xf32> to vector<8xf32>
    %32 = vector.shape_cast %31 : vector<8xf32> to vector<8x1xf32>
    %33 = vector.broadcast %32 : vector<8x1xf32> to vector<8x32xf32>
    %34 = arith.subf %22, %33 : vector<8x32xf32>
    %35 = math.exp %34 : vector<8x32xf32>
    %cst_12 = arith.constant dense<0.000000e+00> : vector<8xf32>
    %36 = vector.multi_reduction <add>, %35, %cst_12 [1] : vector<8x32xf32> to vector<8xf32>
    %37 = vector.shape_cast %36 : vector<8xf32> to vector<8x1xf32>
    %38 = math.log %37 : vector<8x1xf32>
    %39 = arith.addf %32, %38 : vector<8x1xf32>
    %40 = arith.subf %30, %39 : vector<8x1xf32>
    %41 = math.exp %40 : vector<8x1xf32>
    %cst_13 = arith.constant 9.99999993E-9 : f32
    %42 = vector.broadcast %cst_13 : f32 to vector<8x1xf32>
    %43 = arith.addf %41, %42 : vector<8x1xf32>
    %44 = math.log %43 : vector<8x1xf32>
    %cst_14 = arith.constant 0.000000e+00 : f32
    %45 = vector.broadcast %cst_14 : f32 to vector<8x1xf32>
    %46 = arith.subf %45, %44 : vector<8x1xf32>
    %c0_15 = arith.constant 0 : index
    %47 = memref.load %arg1[%c0_15] : memref<1xf32, #tpu.memory_space<smem>>
    %48 = vector.broadcast %47 : f32 to vector<8x1xf32>
    %49 = arith.mulf %48, %46 : vector<8x1xf32>
    %50 = arith.subf %21, %49 : vector<8x1xf32>
    %c0_16 = arith.constant 0 : index
    %c0_17 = arith.constant 0 : index
    %51 = vector.load %arg6[%c0_16, %c0_17] : memref<8x1xf32, #tpu.memory_space<vmem>>, vector<8x1xf32>
    tpu.vector_store %arg6[%c0_16, %c0_17], %50 {strides = array<i32>} : memref<8x1xf32, #tpu.memory_space<vmem>>, vector<8x1xf32>,
    return
  }
  func.func @transform_0(%arg0: i32) -> i32 {
    %c0_i32 = arith.constant 0 : i32
    %c0_i32_0 = arith.constant 0 : i32
    return %c0_i32 : i32
  }
  func.func @transform_1(%arg0: i32) -> (i32, i32) {
    %c0_i32 = arith.constant 0 : i32
    %c0_i32_0 = arith.constant 0 : i32
    return %arg0, %c0_i32 : i32, i32
  }
  func.func @transform_2(%arg0: i32) -> (i32, i32) {
    %c0_i32 = arith.constant 0 : i32
    %c0_i32_0 = arith.constant 0 : i32
    return %arg0, %c0_i32 : i32, i32
  }
  func.func @transform_3(%arg0: i32) -> (i32, i32) {
    %c0_i32 = arith.constant 0 : i32
    %c0_i32_0 = arith.constant 0 : i32
    return %arg0, %c0_i32 : i32, i32
  }
  func.func @transform_4(%arg0: i32) -> (i32, i32) {
    %c0_i32 = arith.constant 0 : i32
    %c0_i32_0 = arith.constant 0 : i32
    return %arg0, %c0_i32 : i32, i32
  }
  func.func @transform_5(%arg0: i32) -> (i32, i32) {
    %c0_i32 = arith.constant 0 : i32
    %c0_i32_0 = arith.constant 0 : i32
    return %arg0, %c0_i32 : i32, i32
  }
}

</mosaic_0001>

<bundles_post_ra>
// kernel: tpu_custom_call.1
= control target key start
LH: loop header
LB: loop body
LE: loop exit
PB: predicated region body
PF: predicated region fallthrough
CT: control target
= control target key end

     0   :  { %vm31_vm0 = vcmask 261120   ;;  %v101_v2 = vmov 0   ;;  %v23_v7 = vlaneseq  ;;  %vm80_vm3 = vcmask 7168   ;;  %s156_s3 = inlined_call_operand.vmem [shape: f32[8,32], index: 3, kind: input, shape index: {}]   ;;  %s157_s1 = inlined_call_operand.vmem [shape: f32[8,32], index: 1, kind: input, shape index: {}]   ;;  %s158_s4 = inlined_call_operand.vmem [shape: s32[8,1], index: 4, kind: input, shape index: {}]   ;;  %s159_s2 = inlined_call_operand.vmem [shape: s32[8,1], index: 2, kind: input, shape index: {}]   ;;  %s160_s0 = inlined_call_operand.<no memory space> [shape: f32[1], index: 0, kind: input, shape index: {}]   ;;  %s161_s5 = inlined_call_operand.vmem [shape: f32[8,1], index: 5, kind: output, shape index: {}]  }
   0x1   :  { %v48_v0 = vld [vmem:[%s156_s3] sm:$0xff]  ;;  %87 = vset.pattern.permute.xlu1 %v101_v2  ;;  %88 = vset.pattern.permute.xlu0 %v101_v2  ;;  %v77_v40 = vstv %s160_s0 }
   0x2   :  { %v25_v1 = vld [vmem:[%s157_s1] sm:$0xff]  ;;  %v57_v4 = vsel %vm31_vm0, %v48_v0, -inf  ;;  %v24_v8 = vand.u32 127, %v23_v7 }
   0x3   :  { %v22_v3 = vld [vmem:[%s158_s4] sm:$0xff]  ;;  %58 = vmax.xlane.f32.xlu0 %v57_v4  ;;  %v35_v6 = vsel %vm31_vm0, %v25_v1, -inf }
   0x4   :  { %50 = vperm.xlu1 %87, %v22_v3   ;;  %v21_v5 = vld [vmem:[%s159_s2] sm:$0xff] }
   0x7   :  { %36 = vmax.xlane.f32.xlu0 %v35_v6 }
   0x8   :  { %27 = vperm.xlu1 %87, %v21_v5  }
  0x83   :  { %v51_v9 = vpop.permute.xlu1 %50 }
  0x84   :  { %vm52_vm1 = vcmp.eq.s32.totalorder %v24_v8, %v51_v9 }
  0x85   :  { %v53_v10 = vsel %vm52_vm1, %v48_v0, 0.0 }
  0x86   :  { %v54_v11 = vsel %vm31_vm0, %v53_v10, 0.0 }
  0x87   :  { %55 = vadd.xlane.f32.xlu1 %v54_v11  ;;  %v28_v18 = vpop.permute.xlu1 %27 }
  0x88   :  { %vm29_vm2 = vcmp.eq.s32.totalorder %v24_v8, %v28_v18 }
  0x89   :  { %v30_v22 = vsel %vm29_vm2, %v25_v1, 0.0 }
  0x8a   :  { %v32_v24 = vsel %vm31_vm0, %v30_v22, 0.0 }
  0x90   :  { %v59_v12 = vpop.xlane.xlu0 %58 }
  0x91   :  { %v60_v13 = vsub.f32 %v48_v0, %v59_v12 }
  0x93   :  { %v61_v14 = vmul.f32 1.442695, %v60_v13 }
  0x94   :  { %v37_v15 = vpop.xlane.xlu0 %36 }
  0x95   :  { %89 = vpow2.f32 %v61_v14  ;;  %v38_v16 = vsub.f32 %v25_v1, %v37_v15 }
  0x97   :  { %v39_v17 = vmul.f32 1.442695, %v38_v16 }
  0x99   :  { %91 = vpow2.f32 %v39_v17 }
  0x9f   :  { %v90_v19 = vpop.eup %89 }
  0xa0   :  { %v63_v20 = vsel %vm31_vm0, %v90_v19, 0.0 }
  0xa1   :  { %64 = vadd.xlane.f32.xlu0 %v63_v20 }
  0xa3   :  { %v92_v21 = vpop.eup %91 }
  0xa4   :  { %v41_v23 = vsel %vm31_vm0, %v92_v21, 0.0 }
  0xa5   :  { %42 = vadd.xlane.f32.xlu0 %v41_v23 }
  0xa9   :  { %33 = vadd.xlane.f32.xlu0 %v32_v24 }
 0x114   :  { %v56_v28 = vpop.xlane.xlu1 %55 }
 0x12e   :  { %v65_v25 = vpop.xlane.xlu0 %64 }
 0x12f   :  { %93 = vlog2.f32 %v65_v25 }
 0x132   :  { %v43_v32 = vpop.xlane.xlu0 %42 }
 0x136   :  { %v34_v42 = vpop.xlane.xlu0 %33 }
 0x139   :  { %v94_v26 = vpop.eup %93 }
 0x13a   :  { %v67_v27 = vmul.f32 0.6931472, %v94_v26 }
 0x13c   :  { %v68_v29 = vadd.f32 %v67_v27, %v59_v12 }
 0x13e   :  { %v69_v30 = vsub.f32 %v56_v28, %v68_v29 }
 0x140   :  { %v70_v31 = vmul.f32 1.442695, %v69_v30 }
 0x142   :  { %95 = vpow2.f32 %v70_v31 }
 0x143   :  { %97 = vlog2.f32 %v43_v32 }
 0x14c   :  { %v96_v33 = vpop.eup %95 }
 0x14d   :  { %v72_v34 = vadd.f32 1e-08, %v96_v33  ;;  %v98_v35 = vpop.eup %97 }
 0x14e   :  { %v45_v36 = vmul.f32 0.6931472, %v98_v35 }
 0x14f   :  { %99 = vlog2.f32 %v72_v34 }
 0x150   :  { %v46_v38 = vadd.f32 %v45_v36, %v37_v15 }
 0x152   :  { %v47_v43 = vsub.f32 %v46_v38, %v34_v42 }
 0x159   :  { %v100_v37 = vpop.eup %99 }
 0x15a   :  { %v74_v39 = vmul.f32 0.6931472, %v100_v37 }
 0x15c   :  { %v75_v41 = vsub.f32 0.0, %v74_v39 }
 0x15e   :  { %v78_v44 = vmul.f32 %v77_v40, %v75_v41 }
 0x160   :  { %v79_v45 = vsub.f32 %v47_v43, %v78_v44 }
 0x162   :  { %81 = vst.msk [vmem:[%s161_s5] sm:$0xff] %vm80_vm3, %v79_v45 }

</bundles_post_ra>
